<compile_context>
chip_gen: v6e
topology: v6e:2x2x1
jax: 0.10.0
libtpu: 0.0.40
codegen_flags: <defaults>
</compile_context>

<pallas_src>
import functools

import numpy as np

import jax
import jax.numpy as jnp
from jax import lax
from jax.experimental import pallas as pl
from jax.experimental.pallas import tpu as pltpu

_BN_EPS = 1e-5
_GN_EPS = 1e-5


# ---------------------------------------------------------------------------
# pltpu.roll direction probe (tiny kernel, run once, cached) so the depthwise
# shift logic is robust to the rotate-direction convention.
# ---------------------------------------------------------------------------
@functools.lru_cache(maxsize=1)
def _roll_matches_jnp():
    """True iff pltpu.roll(x, s, axis) behaves like jnp.roll(x, s, axis)."""

    def probe(x_ref, o_ref):
        o_ref[...] = pltpu.roll(x_ref[...], shift=1, axis=1)

    x = jnp.broadcast_to(jnp.arange(256, dtype=jnp.float32), (8, 256))
    y = pl.pallas_call(
        probe, out_shape=jax.ShapeDtypeStruct((8, 256), jnp.float32))(x)
    return bool(jax.device_get(y)[0, 0] == 255.0)


# ---------------------------------------------------------------------------
# The fused Block kernel.
# Activations: (C, M) with lane = t*Ns + n (slab-major, see module docstring).
# ---------------------------------------------------------------------------
def _block_kernel(
    x_ref, taps_ref, chan_ref, sqw_ref, lcw0_ref, lcw1_ref,
    out_ref,
    *, B, C, H, W, Z, heads, r, roll_like_jnp,
):
    f32 = jnp.float32
    Hs, Ws, Zs = H // r, W // r, Z // r
    r3 = r * r * r
    Nsb = Hs * Ws * Zs            # sparse voxels per sample
    Ns = B * Nsb                  # coarse lane extent (one slab)
    M = r3 * Ns                   # == B*H*W*Z, total lanes
    SP = H * W * Z
    hd = C // heads

    def matmul(a, b):
        return jnp.dot(a, b, preferred_element_type=f32)

    # ---- packed parameters -------------------------------------------------
    chan = chan_ref[...]                     # (C, 7)
    bn1_g, bn1_b = chan[:, 0:1], chan[:, 1:2]
    bn2_g, bn2_b = chan[:, 2:3], chan[:, 3:4]
    ct_b = chan[:, 4:5]
    gn_g, gn_b = chan[:, 5:6], chan[:, 6:7]

    sqw = sqw_ref[...]                       # (C, 6C + r^3)
    pw0 = sqw[:, 0:C]
    pw1 = sqw[:, C:2 * C]
    lrd = sqw[:, 2 * C:3 * C]
    wq = sqw[:, 3 * C:4 * C]
    wk = sqw[:, 4 * C:5 * C]
    wv = sqw[:, 5 * C:6 * C]
    ctw = sqw[:, 6 * C:6 * C + r3]

    taps_all = taps_ref[...]                 # (C, 81)
    lcw0 = lcw0_ref[...]                     # (4C, 2C)
    lcw1 = lcw1_ref[...]                     # (C, 8C)

    # ---- building blocks ----------------------------------------------------
    def depthwise3x3x3(v, taps):
        # Depthwise 3x3x3 conv, padding=1, groups=C (cross-correlation),
        # in the slab layout.  taps: (C, 27), tap index = i*9 + j*3 + l of the
        # torch (C, 1, 3, 3, 3) weight.  Per (output slab, tap): one source
        # slab, one single-vreg lane roll on the coarse axis, and a coarse
        # boundary mask only where a tap crosses an r-block edge.
        n_iota = lax.broadcasted_iota(jnp.int32, (1, Ns), 1)
        zc = n_iota % Zs
        wc = (n_iota // Zs) % Ws
        hc = (n_iota // (Ws * Zs)) % Hs
        up_ok = (hc <= Hs - 2, wc <= Ws - 2, zc <= Zs - 2)
        dn_ok = (hc >= 1, wc >= 1, zc >= 1)
        stride = (Ws * Zs, Zs, 1)

        src = [v[:, t * Ns:(t + 1) * Ns] for t in range(r3)]   # lane-aligned
        acc = [jnp.zeros((C, Ns), f32) for _ in range(r3)]

        for dh in (-1, 0, 1):
            for dw in (-1, 0, 1):
                for dz in (-1, 0, 1):
                    tap = (dh + 1) * 9 + (dw + 1) * 3 + (dz + 1)
                    # hoist the per-tap lane-broadcast out of the slab loop
                    wlane = jnp.broadcast_to(taps[:, tap:tap + 1], (C, Ns))
                    for t_out in range(r3):
                        intra = (t_out // (r * r), (t_out // r) % r, t_out % r)
                        delta = 0          # source coarse-lane offset
                        t_src = 0
                        mask = None
                        for ax, d in enumerate((dh, dw, dz)):
                            s = intra[ax] + d
                            if s < 0:                      # cross block down
                                si = r - 1
                                delta -= stride[ax]
                                m = dn_ok[ax]
                            elif s >= r:                   # cross block up
                                si = 0
                                delta += stride[ax]
                                m = up_ok[ax]
                            else:                          # stays in block
                                si = s
                                m = None
                            t_src = t_src * r + si
                            if m is not None:
                                mask = m if mask is None else \
                                    jnp.logical_and(mask, m)
                        piece = src[t_src]
                        if delta != 0:
                            amt = (-delta if roll_like_jnp else delta) % Ns
                            piece = pltpu.roll(piece, shift=amt, axis=1)
                        if mask is not None:
                            piece = jnp.where(mask, piece, 0.0)
                        acc[t_out] = acc[t_out] + piece * wlane
        return jnp.concatenate(acc, axis=1)

    def batchnorm(v, gamma, beta):
        # training-mode BatchNorm3d, centered two-pass (biased) variance
        mu = jnp.mean(v, axis=1, keepdims=True)
        cen = v - mu
        var = jnp.mean(cen * cen, axis=1, keepdims=True)
        return cen * (gamma * lax.rsqrt(var + _BN_EPS)) + beta

    def gelu_exact(v):
        # nn.GELU() default: 0.5*x*(1+erf(x/sqrt(2))); erf via A&S 7.1.26
        zz = v * 0.7071067811865476
        az = jnp.abs(zz)
        t = pl.reciprocal(1.0 + 0.3275911 * az)
        poly = ((((1.061405429 * t - 1.453152027) * t + 1.421413741) * t
                 - 0.284496736) * t + 0.254829592) * t
        erf_abs = 1.0 - poly * jnp.exp(-az * az)
        erf = jnp.where(zz >= 0.0, erf_abs, -erf_abs)
        return 0.5 * v * (1.0 + erf)

    def line_conv(v, w0, w1):
        return matmul(w1, gelu_exact(matmul(w0, v)))

    # ---- Block forward -------------------------------------------------------
    x = x_ref[...]

    # PatchPartition 1 + residual
    x = depthwise3x3x3(x, taps_all[:, 0:27]) + x

    # LocalRepresentationsCongregation + residual
    xin = x
    y = matmul(pw0, batchnorm(x, bn1_g, bn1_b))
    y = depthwise3x3x3(y, taps_all[:, 27:54])
    y = matmul(pw1, batchnorm(y, bn2_g, bn2_b))
    x = y + xin

    # LineConv 1 + residual
    x = line_conv(x, lcw0[:, 0:C], lcw1[:, 0:4 * C]) + x

    # PatchPartition 2 + residual
    x = depthwise3x3x3(x, taps_all[:, 54:81]) + x

    # GlobalSparseTransformer -> LocalReverseDiffusion + residual
    xin = x
    xs = x[:, 0:Ns]                    # sparse sampler == slab t = 0 (free)
    q_all = matmul(wq, xs)             # rows ordered head*hd + d
    k_all = matmul(wk, xs)
    v_all = matmul(wv, xs)
    head_out = []
    for h in range(heads):
        rs = slice(h * hd, (h + 1) * hd)
        per_b = []
        for b in range(B):
            cs = slice(b * Nsb, (b + 1) * Nsb)
            q = q_all[rs, cs]
            k = k_all[rs, cs]
            v = v_all[rs, cs]
            s = matmul(q.T, k)                          # (Nsb, Nsb), unscaled
            s = s - jnp.max(s, axis=-1, keepdims=True)
            p = jnp.exp(s)
            p = p * pl.reciprocal(jnp.sum(p, axis=-1, keepdims=True))
            o = lax.dot_general(v, p, (((1,), (1,)), ((), ())),
                                preferred_element_type=f32)   # (hd, Nsb)
            per_b.append(o)
        head_out.append(jnp.concatenate(per_b, axis=1))        # (hd, Ns)
    ys = jnp.concatenate(head_out, axis=0)                     # (C, Ns)

    # grouped ConvTranspose3d(k=r, stride=r): per-slab scale + bias
    parts = [ys * jnp.broadcast_to(ctw[:, t:t + 1], (C, Ns)) for t in range(r3)]
    yt = jnp.concatenate(parts, axis=1) + ct_b                 # (C, M)

    # GroupNorm(num_groups=1): per-sample centered stats over (C, H, W, Z)
    lane = lax.broadcasted_iota(jnp.int32, (1, M), 1)
    b_of = (lane % Ns) // Nsb
    inv = 1.0 / (C * SP)
    mu_map = jnp.zeros((1, M), f32)
    for b in range(B):
        sel = b_of == b
        s1 = jnp.sum(jnp.sum(jnp.where(sel, yt, 0.0), axis=1, keepdims=True),
                     axis=0, keepdims=True)
        mu_map = jnp.where(sel, s1 * inv, mu_map)
    cent = yt - mu_map
    var_map = jnp.zeros((1, M), f32)
    for b in range(B):
        sel = b_of == b
        s2 = jnp.sum(jnp.sum(jnp.where(sel, cent * cent, 0.0),
                             axis=1, keepdims=True),
                     axis=0, keepdims=True)
        var_map = jnp.where(sel, s2 * inv, var_map)
    yt = cent * lax.rsqrt(var_map + _GN_EPS) * gn_g + gn_b
    x = matmul(lrd, yt) + xin

    # LineConv 2 + residual
    x = line_conv(x, lcw0[:, C:2 * C], lcw1[:, 4 * C:8 * C]) + x

    out_ref[...] = x.astype(out_ref.dtype)


# ---------------------------------------------------------------------------
# Host-side layout plumbing + the pallas_call wrapper
# ---------------------------------------------------------------------------
def _to_slab_layout(x, r):
    """(B, C, H, W, Z) -> (C, M) with lane = (hi*r^2+wi*r+zi)*Ns + n."""
    B, C, H, W, Z = x.shape
    Hs, Ws, Zs = H // r, W // r, Z // r
    xb = x.reshape(B, C, Hs, r, Ws, r, Zs, r)
    xb = jnp.transpose(xb, (1, 3, 5, 7, 0, 2, 4, 6))
    return xb.reshape(C, r ** 3 * B * Hs * Ws * Zs)


def _from_slab_layout(xf, B, C, H, W, Z, r):
    Hs, Ws, Zs = H // r, W // r, Z // r
    xb = xf.reshape(C, r, r, r, B, Hs, Ws, Zs)
    xb = jnp.transpose(xb, (4, 0, 5, 1, 6, 2, 7, 3))
    return xb.reshape(B, C, H, W, Z)


@functools.partial(jax.jit, static_argnames=("heads", "r", "roll_like_jnp"))
def _block_forward_impl(x_ncdhw, params, *, heads, r, roll_like_jnp):
    B, C, H, W, Z = x_ncdhw.shape
    assert C % heads == 0 and H % r == 0 and W % r == 0 and Z % r == 0
    M = B * H * W * Z
    hd = C // heads
    r3 = r ** 3

    x_flat = _to_slab_layout(x_ncdhw, r)

    # split + reorder the qkv conv weight so row ordering matches the output
    # channel order head*head_dim + d implied by the reference .view()/.split()
    q_rows = np.asarray(
        [hh * 3 * hd + d for hh in range(heads) for d in range(hd)], np.int32)
    wq = params["qkv_w"][q_rows, :]
    wk = params["qkv_w"][q_rows + hd, :]
    wv = params["qkv_w"][q_rows + 2 * hd, :]

    col = lambda a: a.reshape(C, 1)

    # consolidated operands (fewer tiny DMAs / padded (8,128) tiles)
    chan_params = jnp.concatenate([
        col(params["lrc_bn1_gamma"]), col(params["lrc_bn1_beta"]),
        col(params["lrc_bn2_gamma"]), col(params["lrc_bn2_beta"]),
        col(params["ct_b"]), col(params["gn_gamma"]), col(params["gn_beta"]),
    ], axis=1)                                                    # (C, 7)
    dw_taps = jnp.concatenate(
        [params["patch1_dw"], params["lrc_dw"], params["patch2_dw"]],
        axis=1)                                                   # (C, 81)
    sq_w = jnp.concatenate(
        [params["lrc_pw0"], params["lrc_pw1"], params["lrd_pw"],
         wq, wk, wv, params["ct_w"]], axis=1)                     # (C, 6C+r^3)
    lc_w0 = jnp.concatenate([params["lc1_w0"], params["lc2_w0"]], axis=1)
    lc_w1 = jnp.concatenate([params["lc1_w1"], params["lc2_w1"]], axis=1)

    kernel = functools.partial(
        _block_kernel, B=B, C=C, H=H, W=W, Z=Z, heads=heads, r=r,
        roll_like_jnp=roll_like_jnp)

    vmem = pl.BlockSpec(memory_space=pltpu.MemorySpace.VMEM)
    out_flat = pl.pallas_call(
        kernel,
        out_shape=jax.ShapeDtypeStruct((C, M), jnp.float32),
        in_specs=[vmem] * 6,
        out_specs=vmem,
        compiler_params=pltpu.CompilerParams(
            vmem_limit_bytes=32 * 1024 * 1024),
    )(x_flat, dw_taps, chan_params, sq_w, lc_w0, lc_w1)

    return _from_slab_layout(out_flat, B, C, H, W, Z, r)


def block_forward(x_ncdhw, params, *, heads, r):
    """Forward pass of `Block` for x of shape (B, C, H, W, Z) (NCDHW)."""
    return _block_forward_impl(
        x_ncdhw, params, heads=heads, r=r, roll_like_jnp=_roll_matches_jnp())


# ---------------------------------------------------------------------------
# Pure-XLA reference (mirrors the PyTorch module), used for validation only.
# ---------------------------------------------------------------------------
@functools.partial(jax.jit, static_argnames=("heads", "r"))
def block_forward_reference(x, params, *, heads, r):
    B, C, H, W, Z = x.shape
    hd = C // heads
    HIGH = jax.lax.Precision.HIGHEST

    def pw(v, w):
        return jnp.einsum("oc,bcdhw->bodhw", w, v, precision=HIGH)

    def depthwise(v, taps):
        vp = jnp.pad(v, ((0, 0), (0, 0), (1, 1), (1, 1), (1, 1)))
        out = jnp.zeros_like(v)
        t = 0
        for i in range(3):
            for j in range(3):
                for l in range(3):
                    out = out + vp[:, :, i:i + H, j:j + W, l:l + Z] * \
                        taps[:, t].reshape(1, C, 1, 1, 1)
                    t += 1
        return out

    def bn(v, g, b):
        mu = jnp.mean(v, axis=(0, 2, 3, 4), keepdims=True)
        var = jnp.var(v, axis=(0, 2, 3, 4), keepdims=True)
        return ((v - mu) / jnp.sqrt(var + _BN_EPS)) * g.reshape(1, C, 1, 1, 1) \
            + b.reshape(1, C, 1, 1, 1)

    def line(v, w0, w1):
        return pw(jax.nn.gelu(pw(v, w0), approximate=False), w1)

    x = depthwise(x, params["patch1_dw"]) + x

    xin = x
    y = pw(bn(x, params["lrc_bn1_gamma"], params["lrc_bn1_beta"]),
           params["lrc_pw0"])
    y = depthwise(y, params["lrc_dw"])
    y = pw(bn(y, params["lrc_bn2_gamma"], params["lrc_bn2_beta"]),
           params["lrc_pw1"])
    x = y + xin

    x = line(x, params["lc1_w0"], params["lc1_w1"]) + x
    x = depthwise(x, params["patch2_dw"]) + x

    xin = x
    xs = x[:, :, ::r, ::r, ::r]
    Hs, Ws, Zs = xs.shape[2:]
    Ns = Hs * Ws * Zs
    qkv = jnp.einsum("oc,bcdhw->bodhw", params["qkv_w"], xs, precision=HIGH)
    qkv = qkv.reshape(B, heads, 3 * hd, Ns)
    q, k, v = qkv[:, :, :hd], qkv[:, :, hd:2 * hd], qkv[:, :, 2 * hd:]
    attn = jax.nn.softmax(
        jnp.einsum("bhdn,bhdm->bhnm", q, k, precision=HIGH), axis=-1)
    o = jnp.einsum("bhdm,bhnm->bhdn", v, attn, precision=HIGH)
    y = o.reshape(B, C, Hs, Ws, Zs)

    wt = params["ct_w"].reshape(C, r, r, r)
    yt = jnp.einsum("bcxyz,cijl->bcxiyjzl", y, wt)
    yt = yt.reshape(B, C, H, W, Z) + params["ct_b"].reshape(1, C, 1, 1, 1)
    mu = jnp.mean(yt, axis=(1, 2, 3, 4), keepdims=True)
    var = jnp.var(yt, axis=(1, 2, 3, 4), keepdims=True)
    yt = (yt - mu) / jnp.sqrt(var + _GN_EPS)
    yt = yt * params["gn_gamma"].reshape(1, C, 1, 1, 1) \
        + params["gn_beta"].reshape(1, C, 1, 1, 1)
    yt = pw(yt, params["lrd_pw"])
    x = yt + xin

    x = line(x, params["lc2_w0"], params["lc2_w1"]) + x
    return x


# ---------------------------------------------------------------------------
# Deterministic parameter init (shapes follow the PyTorch module __init__)
# ---------------------------------------------------------------------------
def init_params(key, C, r):
    ks = jax.random.split(key, 19)
    w = lambda k, shape, s: jax.random.normal(k, shape, jnp.float32) * s
    gamma = lambda k: 1.0 + 0.1 * jax.random.normal(k, (C,), jnp.float32)
    beta = lambda k: 0.1 * jax.random.normal(k, (C,), jnp.float32)
    return {
        # PatchPartition 1: Conv3d(C, C, 3, pad=1, groups=C) weight.reshape(C, 27)
        "patch1_dw": w(ks[0], (C, 27), 0.1),
        # LocalRepresentationsCongregation
        "lrc_bn1_gamma": gamma(ks[1]), "lrc_bn1_beta": beta(ks[2]),
        "lrc_pw0": w(ks[3], (C, C), 0.2),
        "lrc_dw": w(ks[4], (C, 27), 0.1),
        "lrc_bn2_gamma": gamma(ks[5]), "lrc_bn2_beta": beta(ks[6]),
        "lrc_pw1": w(ks[7], (C, C), 0.2),
        # LineConv1
        "lc1_w0": w(ks[8], (4 * C, C), 0.2),
        "lc1_w1": w(ks[9], (C, 4 * C), 0.1),
        # PatchPartition 2
        "patch2_dw": w(ks[10], (C, 27), 0.1),
        # GlobalSparseTransformer qkv: Conv3d(C, 3C, 1, bias=False)
        "qkv_w": w(ks[11], (3 * C, C), 0.2),
        # LocalReverseDiffusion: ConvTranspose3d weight (C,1,r,r,r).reshape(C, r^3)
        "ct_w": w(ks[12], (C, r ** 3), 0.2),
        "ct_b": w(ks[13], (C,), 0.1),
        "gn_gamma": gamma(ks[14]), "gn_beta": beta(ks[15]),
        "lrd_pw": w(ks[16], (C, C), 0.2),
        # LineConv2
        "lc2_w0": w(ks[17], (4 * C, C), 0.2),
        "lc2_w1": w(ks[18], (C, 4 * C), 0.1),
    }


if __name__ == "__main__":
    B, C, H, W, Z = 2, 8, 8, 8, 8
    heads, r = 2, 2

    key = jax.random.PRNGKey(0)
    kx, kp = jax.random.split(key)
    x = jax.random.normal(kx, (B, C, H, W, Z), jnp.float32)
    params = init_params(kp, C, r)

    out = jax.block_until_ready(block_forward(x, params, heads=heads, r=r))
    assert out.shape == (B, C, H, W, Z), out.shape
    assert bool(jnp.all(jnp.isfinite(out)))

    # validate the fused Pallas kernel against the plain-XLA reference.
    # Tolerance tightened 5x vs. the previous version; the remaining slack
    # covers the A&S erf approximation and possible reduced-precision MXU
    # passes for f32 operands inside the kernel's dots.
    ref = jax.block_until_ready(
        block_forward_reference(x, params, heads=heads, r=r))
    max_err = float(jnp.max(jnp.abs(out - ref)))
    assert max_err < 2e-2, f"Pallas kernel deviates from reference: {max_err}"

    print("KERNEL_OK")
</pallas_src>

<mosaic_0001>
module attributes {stable_mosaic.version = 11 : i64} {
  func.func @probe(%arg0: memref<8x256xf32, #tpu.memory_space<vmem>>, %arg1: memref<8x256xf32, #tpu.memory_space<vmem>>) attributes {dimension_semantics = [], scalar_prefetch = 0 : i64, scratch_operands = 0 : i64, tpu.core_type = #tpu.core_type<tc>} {
    %c0 = arith.constant 0 : index
    %c0_0 = arith.constant 0 : index
    %0 = vector.load %arg0[%c0, %c0_0] : memref<8x256xf32, #tpu.memory_space<vmem>>, vector<8x256xf32>
    %c1_i32 = arith.constant 1 : i32
    %1 = tpu.dynamic_rotate %0 by %c1_i32 dim 1 : vector<8x256xf32>, i32 -> vector<8x256xf32>
    %c0_1 = arith.constant 0 : index
    %c0_2 = arith.constant 0 : index
    %2 = vector.load %arg1[%c0_1, %c0_2] : memref<8x256xf32, #tpu.memory_space<vmem>>, vector<8x256xf32>
    tpu.vector_store %arg1[%c0_1, %c0_2], %1 {strides = array<i32>} : memref<8x256xf32, #tpu.memory_space<vmem>>, vector<8x256xf32>,
    return
  }
}

</mosaic_0001>

<bundles_post_ra>
// kernel: tpu_custom_call.1
= control target key start
LH: loop header
LB: loop body
LE: loop exit
PB: predicated region body
PF: predicated region fallthrough
CT: control target
= control target key end

     0   :  { %6 = vsyncpa [#allocation3], 0  ;;  %s115_s0 = inlined_call_operand.hbm [shape: f32[8,256], index: 0, kind: input, shape index: {}]   ;;  %s116_s1 = inlined_call_operand.hbm [shape: f32[8,256], index: 1, kind: output, shape index: {}]  }
   0x1   :  { %7 = vsyncpa [#allocation4], 0  ;;  %s96_s6 = smov [#allocation2]  }
   0x2   :  { %s14_s7 = sshll.u32 %s96_s6, 4  ;;  %s15_s7 = int_to_ptr.vmem [resolvable:$true] %s14_s7 }
   0x3   :  { %s60_s8 = scalar_lea.vmem %s15_s7, 256  ;;  %p65_p1 = scmp.lt.s32.totalorder %s15_s7, %s15_s7 }
   0x4   :  { %p61_p0 = scmp.ne.s32.totalorder %s15_s7, %s60_s8  ;;  %p66_p2 = scmp.lt.s32.totalorder %s60_s8, %s60_s8 }
   0x6   :  { %p67_p3 = por %p66_p2, %p65_p1 }
   0x8   :  { %p68_p4 = pnand %p67_p3, %p61_p0 }
   0xa   :  { %71 = shalt.err (!%p68_p4)
}
   0xb   :  { %17 = dma.hbm_to_vmem [thread:$0]  %s115_s0, 256, %s15_s7, [#allocation3]  }
   0xc   :  { %92 = dma.done.wait [#allocation3], 256  }
   0xd   :  { %93 = vsyncadd [#allocation3], 4294967040  ;;  %v21_v0 = vld [vmem:[#allocation2] sm:$0xff]  ;;  %s97_s11 = smov 1   ;;  %v22_v1 = vld [vmem:[#allocation2 + $0x8] sm:$0xff]  ;;  %v27_v2 = vlaneseq  ;;  %s98_s12 = smov [#allocation5]  }
   0xe   :  { %23 = vrot.lane.b32.xlu0 %v21_v0, %s97_s11  ;;  %s40_s13 = sshll.u32 %s98_s12, 4  ;;  %s41_s13 = int_to_ptr.vmem [resolvable:$true] %s40_s13 }
   0xf   :  { %v28_v3 = vand.u32 127, %v27_v2  ;;  %s72_s0 = scalar_lea.vmem %s41_s13, 256  ;;  %p77_p6 = scmp.lt.s32.totalorder %s41_s13, %s41_s13 }
  0x10   :  { %p73_p5 = scmp.ne.s32.totalorder %s41_s13, %s72_s0  ;;  %p78_p7 = scmp.lt.s32.totalorder %s72_s0, %s72_s0 }
  0x11   :  { %vm29_vm0 = vcmp.lt.s32.totalorder %v28_v3, 1 }
  0x12   :  { %25 = vrot.lane.b32.xlu0 %v22_v1, %s97_s11  ;;  %p79_p8 = por %p78_p7, %p77_p6 }
  0x14   :  { %p80_p9 = pnand %p79_p8, %p73_p5 }
  0x80   :  { %v24_v4 = vpop.permute.xlu0 %23 }
  0x84   :  { %v26_v5 = vpop.permute.xlu0 %25 }
  0x85   :  { %v30_v6 = vsel %vm29_vm0, %v24_v4, %v26_v5  ;;  %v31_v7 = vsel %vm29_vm0, %v26_v5, %v24_v4 }
  0x86   :  { %32 = vst [vmem:[#allocation5] sm:$0xff] %v31_v7  ;;  %33 = vst [vmem:[#allocation5 + $0x8] sm:$0xff] %v30_v6 }
  0x87   :  { %83 = shalt.err (!%p80_p9)
}
  0x88   :  { %43 = dma.vmem_to_hbm [thread:$0]  %s41_s13, 256, %s116_s1, [#allocation4]  }
  0x89   :  { %94 = dma.done.wait [#allocation4], 256  }
  0x8a   :  { %95 = vsyncadd [#allocation4], 4294967040 }
  0x8b   :  { %47 = vsyncpa [#allocation3], 1 }
  0x8c   :  { %48 = vsyncpa [#allocation4], 1 }

</bundles_post_ra>
